<compile_context>
chip_gen: v7x
topology: tpu7x:2x2x1
jax: 0.10.0
libtpu: 0.0.40
codegen_flags: <defaults>
</compile_context>

<pallas_src>
import functools

import jax
import jax.numpy as jnp
from jax.experimental import pallas as pl
from jax.experimental.pallas import tpu as pltpu


# --------------------------------------------------------------------------- #
# Kernel
# --------------------------------------------------------------------------- #
def _qkv_kernel(x_ref, wq_ref, wk_ref, wv_ref, bq_ref, bk_ref, bv_ref,
                q_ref, k_ref, v_ref, acc_q, acc_k, acc_v):
    # x_ref : (tm, tk)   activation tile (input dtype)
    # w*_ref: (tk, tn)   pre-transposed weight tiles (bf16)
    # b*_ref: (1,  tn)   bias tiles (f32)
    # *_ref : (tm, tn)   q/k/v output tiles
    # acc_* : (tm, tn)   f32 accumulators (VMEM scratch, resident across k)
    kk = pl.program_id(2)

    @pl.when(kk == 0)
    def _init():
        acc_q[...] = jnp.zeros_like(acc_q)
        acc_k[...] = jnp.zeros_like(acc_k)
        acc_v[...] = jnp.zeros_like(acc_v)

    # Feed the MXU in the weight dtype (bf16); accumulate in f32.
    x = x_ref[...].astype(wq_ref.dtype)
    acc_q[...] += jnp.dot(x, wq_ref[...], preferred_element_type=jnp.float32)
    acc_k[...] += jnp.dot(x, wk_ref[...], preferred_element_type=jnp.float32)
    acc_v[...] += jnp.dot(x, wv_ref[...], preferred_element_type=jnp.float32)

    @pl.when(kk == pl.num_programs(2) - 1)
    def _store():
        q_ref[...] = (acc_q[...] + bq_ref[...].astype(jnp.float32)).astype(q_ref.dtype)
        k_ref[...] = (acc_k[...] + bk_ref[...].astype(jnp.float32)).astype(k_ref.dtype)
        v_ref[...] = (acc_v[...] + bv_ref[...].astype(jnp.float32)).astype(v_ref.dtype)


# --------------------------------------------------------------------------- #
# Sizing helpers
# --------------------------------------------------------------------------- #
def _vmem_capacity_bytes():
    try:
        return int(pltpu.get_tpu_info().vmem_capacity_bytes)
    except Exception:
        return 64 * 1024 * 1024  # conservative (v7x per-TensorCore)


def _vmem_limit_bytes(tm, tn, tk, x_dtype, w_dtype, o_dtype):
    xb = jnp.dtype(x_dtype).itemsize
    wb = jnp.dtype(w_dtype).itemsize
    ob = jnp.dtype(o_dtype).itemsize
    working_set = (
        2 * tm * tk * xb          # activation tile, double-buffered
        + 3 * 2 * tk * tn * wb    # 3 weight tiles, double-buffered
        + 3 * 2 * tn * 4          # 3 bias tiles
        + 3 * 2 * tm * tn * ob    # 3 output tiles, double-buffered
        + 3 * tm * tn * 4         # 3 f32 accumulators
    )
    ceiling = (_vmem_capacity_bytes() * 3) // 4   # headroom for compiler scratch
    return int(min(ceiling, max(32 * 1024 * 1024, 2 * working_set)))


def _pick_k_tile(H, tk):
    # Reduction tiles must divide H exactly (a ragged K tile would fold
    # out-of-bounds garbage into the accumulation).
    if H <= tk:
        return H
    if H % tk == 0:
        return tk
    d = (tk // 128) * 128
    while d >= 128:
        if H % d == 0:
            return d
        d -= 128
    return H


# --------------------------------------------------------------------------- #
# pallas_call wrapper
# --------------------------------------------------------------------------- #
@functools.partial(jax.jit, static_argnames=("tm", "tn", "tk"))
def _qkv_matmul(x2d, wq_t, wk_t, wv_t, bq, bk, bv, *, tm, tn, tk):
    M, H = x2d.shape
    grid = (pl.cdiv(H, tn), pl.cdiv(M, tm), H // tk)   # (n, m, k) — reduction last
    out_sds = jax.ShapeDtypeStruct((M, H), x2d.dtype)

    return pl.pallas_call(
        _qkv_kernel,
        out_shape=(out_sds, out_sds, out_sds),
        grid_spec=pltpu.PrefetchScalarGridSpec(
            num_scalar_prefetch=0,
            grid=grid,
            in_specs=[
                pl.BlockSpec((tm, tk), lambda n, m, k: (m, k)),   # activations
                pl.BlockSpec((tk, tn), lambda n, m, k: (k, n)),   # W_q
                pl.BlockSpec((tk, tn), lambda n, m, k: (k, n)),   # W_k
                pl.BlockSpec((tk, tn), lambda n, m, k: (k, n)),   # W_v
                pl.BlockSpec((1, tn), lambda n, m, k: (0, n)),    # b_q
                pl.BlockSpec((1, tn), lambda n, m, k: (0, n)),    # b_k
                pl.BlockSpec((1, tn), lambda n, m, k: (0, n)),    # b_v
            ],
            out_specs=[
                pl.BlockSpec((tm, tn), lambda n, m, k: (m, n)),   # q
                pl.BlockSpec((tm, tn), lambda n, m, k: (m, n)),   # k
                pl.BlockSpec((tm, tn), lambda n, m, k: (m, n)),   # v
            ],
            scratch_shapes=[pltpu.VMEM((tm, tn), jnp.float32)] * 3,
        ),
        compiler_params=pltpu.CompilerParams(
            dimension_semantics=("parallel", "parallel", "arbitrary"),
            vmem_limit_bytes=_vmem_limit_bytes(tm, tn, tk, x2d.dtype,
                                               wq_t.dtype, x2d.dtype),
        ),
    )(x2d, wq_t, wk_t, wv_t, bq, bk, bv)


# --------------------------------------------------------------------------- #
# Public API (matches the PyTorch module's forward semantics)
# --------------------------------------------------------------------------- #
def prepare_qkv_params(wq, bq, wk, bk, wv, bv, *, param_dtype=jnp.bfloat16):
    """One-time weight prep (amortized outside the hot path).

    PyTorch nn.Linear stores W as (out_features, in_features); transpose once
    to (in, out) and cast to the MXU-native dtype (bf16 by default).  Biases
    stay f32 (they are added post-accumulation in f32) as (1, H) rows.
    """
    cast_w = lambda w: w.T.astype(param_dtype)
    row_b = lambda b: b.reshape(1, -1).astype(jnp.float32)
    return (cast_w(wq), cast_w(wk), cast_w(wv), row_b(bq), row_b(bk), row_b(bv))


def qkv_linear(hidden_states, params, *, tm=256, tn=None, tk=512):
    """hidden_states: [B, S, H]; params from prepare_qkv_params.

    Returns (q, k, v), each [B, S, H] — same semantics as QKVLinear.forward.
    """
    wq_t, wk_t, wv_t, bq, bk, bv = params
    B, S, H = hidden_states.shape
    M = B * S
    x2d = hidden_states.reshape(M, H)   # free metadata reshape

    if tn is None:
        # 128-MiB-VMEM parts (v5e/v6e) can afford wider output tiles.
        tn = 1024 if _vmem_capacity_bytes() >= (100 << 20) else 512

    tm_e = M if M <= tm else tm          # full extent for small M, else mult of 8
    tn_e = H if H <= tn else tn          # full extent for small H, else mult of 128
    tk_e = _pick_k_tile(H, tk)           # always divides H exactly

    q, k, v = _qkv_matmul(x2d, wq_t, wk_t, wv_t, bq, bk, bv,
                          tm=tm_e, tn=tn_e, tk=tk_e)
    return (q.reshape(B, S, H), k.reshape(B, S, H), v.reshape(B, S, H))


def _init_linear_params(key, hidden_size, dtype=jnp.float32):
    """Deterministic init mimicking nn.Linear's uniform(-1/sqrt(in), 1/sqrt(in))."""
    kw, kb = jax.random.split(key)
    bound = 1.0 / jnp.sqrt(hidden_size)
    w = jax.random.uniform(kw, (hidden_size, hidden_size), dtype, -bound, bound)
    b = jax.random.uniform(kb, (hidden_size,), dtype, -bound, bound)
    return w, b


# --------------------------------------------------------------------------- #
# Self-test
# --------------------------------------------------------------------------- #
if __name__ == "__main__":
    B, S, H = 2, 8, 32

    root = jax.random.PRNGKey(0)
    kx, key_k, key_q, key_v = jax.random.split(root, 4)

    hidden_states = jax.random.normal(kx, (B, S, H), jnp.float32)
    wk, bk = _init_linear_params(key_k, H)
    wq, bq = _init_linear_params(key_q, H)
    wv, bv = _init_linear_params(key_v, H)

    # One-time weight fusion/cast (outside the per-call hot path).
    params = prepare_qkv_params(wq, bq, wk, bk, wv, bv)

    q, k, v = qkv_linear(hidden_states, params)
    jax.block_until_ready((q, k, v))

    x2d = hidden_states.reshape(B * S, H)

    # Reference 1: exact kernel semantics (bf16-rounded operands, f32 accumulate).
    xb = x2d.astype(jnp.bfloat16).astype(jnp.float32)

    def ref_bf16(w, b):
        wb = w.astype(jnp.bfloat16).astype(jnp.float32)
        return (xb @ wb.T + b).reshape(B, S, H)

    assert jnp.allclose(q, ref_bf16(wq, bq), atol=1e-3, rtol=1e-3), "q mismatch (bf16 ref)"
    assert jnp.allclose(k, ref_bf16(wk, bk), atol=1e-3, rtol=1e-3), "k mismatch (bf16 ref)"
    assert jnp.allclose(v, ref_bf16(wv, bv), atol=1e-3, rtol=1e-3), "v mismatch (bf16 ref)"

    # Reference 2: full-f32 PyTorch-equivalent math (loose tol: bf16 MXU feed).
    q32 = (x2d @ wq.T + bq).reshape(B, S, H)
    k32 = (x2d @ wk.T + bk).reshape(B, S, H)
    v32 = (x2d @ wv.T + bv).reshape(B, S, H)
    assert jnp.allclose(q, q32, atol=1e-1), "q mismatch (f32 ref)"
    assert jnp.allclose(k, k32, atol=1e-1), "k mismatch (f32 ref)"
    assert jnp.allclose(v, v32, atol=1e-1), "v mismatch (f32 ref)"

    print("KERNEL_OK")
</pallas_src>

<mosaic_0001>
module attributes {stable_mosaic.version = 11 : i64} {
  func.func @_qkv_kernel(%arg0: i32, %arg1: i32, %arg2: i32, %arg3: memref<16x32xf32, #tpu.memory_space<vmem>>, %arg4: memref<32x32xbf16, #tpu.memory_space<vmem>>, %arg5: memref<32x32xbf16, #tpu.memory_space<vmem>>, %arg6: memref<32x32xbf16, #tpu.memory_space<vmem>>, %arg7: memref<1x32xf32, #tpu.memory_space<vmem>>, %arg8: memref<1x32xf32, #tpu.memory_space<vmem>>, %arg9: memref<1x32xf32, #tpu.memory_space<vmem>>, %arg10: memref<16x32xf32, #tpu.memory_space<vmem>>, %arg11: memref<16x32xf32, #tpu.memory_space<vmem>>, %arg12: memref<16x32xf32, #tpu.memory_space<vmem>>, %arg13: memref<16x32xf32, #tpu.memory_space<vmem>>, %arg14: memref<16x32xf32, #tpu.memory_space<vmem>>, %arg15: memref<16x32xf32, #tpu.memory_space<vmem>>) attributes {dimension_semantics = [#tpu.dimension_semantics<parallel>, #tpu.dimension_semantics<parallel>, #tpu.dimension_semantics<arbitrary>], iteration_bounds = array<i64: 1, 1, 1>, scalar_prefetch = 0 : i64, scratch_operands = 3 : i64, tpu.core_type = #tpu.core_type<tc>, window_params = [{transform_indices = @transform_0, window_bounds = array<i64: 16, 32>}, {transform_indices = @transform_1, window_bounds = array<i64: 32, 32>}, {transform_indices = @transform_2, window_bounds = array<i64: 32, 32>}, {transform_indices = @transform_3, window_bounds = array<i64: 32, 32>}, {transform_indices = @transform_4, window_bounds = array<i64: 1, 32>}, {transform_indices = @transform_5, window_bounds = array<i64: 1, 32>}, {transform_indices = @transform_6, window_bounds = array<i64: 1, 32>}, {transform_indices = @transform_7, window_bounds = array<i64: 16, 32>}, {transform_indices = @transform_8, window_bounds = array<i64: 16, 32>}, {transform_indices = @transform_9, window_bounds = array<i64: 16, 32>}]} {
    %c0_i32 = arith.constant 0 : i32
    %0 = arith.cmpi eq, %arg2, %c0_i32 : i32
    %1 = arith.extui %0 : i1 to i32
    %c0_i32_0 = arith.constant 0 : i32
    %2 = arith.cmpi ne, %1, %c0_i32_0 : i32
    scf.if %2 {
      %cst_24 = arith.constant 0.000000e+00 : f32
      %23 = vector.broadcast %cst_24 : f32 to vector<16x32xf32>
      %c0_25 = arith.constant 0 : index
      %c0_26 = arith.constant 0 : index
      %24 = vector.load %arg13[%c0_25, %c0_26] : memref<16x32xf32, #tpu.memory_space<vmem>>, vector<16x32xf32>
      tpu.vector_store %arg13[%c0_25, %c0_26], %23 {strides = array<i32>} : memref<16x32xf32, #tpu.memory_space<vmem>>, vector<16x32xf32>,
      %cst_27 = arith.constant 0.000000e+00 : f32
      %25 = vector.broadcast %cst_27 : f32 to vector<16x32xf32>
      %c0_28 = arith.constant 0 : index
      %c0_29 = arith.constant 0 : index
      %26 = vector.load %arg14[%c0_28, %c0_29] : memref<16x32xf32, #tpu.memory_space<vmem>>, vector<16x32xf32>
      tpu.vector_store %arg14[%c0_28, %c0_29], %25 {strides = array<i32>} : memref<16x32xf32, #tpu.memory_space<vmem>>, vector<16x32xf32>,
      %cst_30 = arith.constant 0.000000e+00 : f32
      %27 = vector.broadcast %cst_30 : f32 to vector<16x32xf32>
      %c0_31 = arith.constant 0 : index
      %c0_32 = arith.constant 0 : index
      %28 = vector.load %arg15[%c0_31, %c0_32] : memref<16x32xf32, #tpu.memory_space<vmem>>, vector<16x32xf32>
      tpu.vector_store %arg15[%c0_31, %c0_32], %27 {strides = array<i32>} : memref<16x32xf32, #tpu.memory_space<vmem>>, vector<16x32xf32>,
    } else {
    }
    %c0 = arith.constant 0 : index
    %c0_1 = arith.constant 0 : index
    %3 = vector.load %arg3[%c0, %c0_1] : memref<16x32xf32, #tpu.memory_space<vmem>>, vector<16x32xf32>
    %4 = arith.truncf %3 : vector<16x32xf32> to vector<16x32xbf16>
    %c0_2 = arith.constant 0 : index
    %c0_3 = arith.constant 0 : index
    %5 = vector.load %arg13[%c0_2, %c0_3] : memref<16x32xf32, #tpu.memory_space<vmem>>, vector<16x32xf32>
    %c0_4 = arith.constant 0 : index
    %c0_5 = arith.constant 0 : index
    %6 = vector.load %arg4[%c0_4, %c0_5] : memref<32x32xbf16, #tpu.memory_space<vmem>>, vector<32x32xbf16>
    %cst = arith.constant dense<0.000000e+00> : vector<16x32xf32>
    %7 = tpu.matmul %4, %6, %cst {dimension_numbers = #tpu.dot_dimension_numbers<[1], [0], [0], [1], [0, 0, 1, 1], [], []>} : vector<16x32xbf16>, vector<32x32xbf16>, vector<16x32xf32> -> vector<16x32xf32>
    %8 = arith.addf %5, %7 : vector<16x32xf32>
    %c0_6 = arith.constant 0 : index
    %c0_7 = arith.constant 0 : index
    %9 = vector.load %arg13[%c0_6, %c0_7] : memref<16x32xf32, #tpu.memory_space<vmem>>, vector<16x32xf32>
    tpu.vector_store %arg13[%c0_6, %c0_7], %8 {strides = array<i32>} : memref<16x32xf32, #tpu.memory_space<vmem>>, vector<16x32xf32>,
    %c0_8 = arith.constant 0 : index
    %c0_9 = arith.constant 0 : index
    %10 = vector.load %arg14[%c0_8, %c0_9] : memref<16x32xf32, #tpu.memory_space<vmem>>, vector<16x32xf32>
    %c0_10 = arith.constant 0 : index
    %c0_11 = arith.constant 0 : index
    %11 = vector.load %arg5[%c0_10, %c0_11] : memref<32x32xbf16, #tpu.memory_space<vmem>>, vector<32x32xbf16>
    %cst_12 = arith.constant dense<0.000000e+00> : vector<16x32xf32>
    %12 = tpu.matmul %4, %11, %cst_12 {dimension_numbers = #tpu.dot_dimension_numbers<[1], [0], [0], [1], [0, 0, 1, 1], [], []>} : vector<16x32xbf16>, vector<32x32xbf16>, vector<16x32xf32> -> vector<16x32xf32>
    %13 = arith.addf %10, %12 : vector<16x32xf32>
    %c0_13 = arith.constant 0 : index
    %c0_14 = arith.constant 0 : index
    %14 = vector.load %arg14[%c0_13, %c0_14] : memref<16x32xf32, #tpu.memory_space<vmem>>, vector<16x32xf32>
    tpu.vector_store %arg14[%c0_13, %c0_14], %13 {strides = array<i32>} : memref<16x32xf32, #tpu.memory_space<vmem>>, vector<16x32xf32>,
    %c0_15 = arith.constant 0 : index
    %c0_16 = arith.constant 0 : index
    %15 = vector.load %arg15[%c0_15, %c0_16] : memref<16x32xf32, #tpu.memory_space<vmem>>, vector<16x32xf32>
    %c0_17 = arith.constant 0 : index
    %c0_18 = arith.constant 0 : index
    %16 = vector.load %arg6[%c0_17, %c0_18] : memref<32x32xbf16, #tpu.memory_space<vmem>>, vector<32x32xbf16>
    %cst_19 = arith.constant dense<0.000000e+00> : vector<16x32xf32>
    %17 = tpu.matmul %4, %16, %cst_19 {dimension_numbers = #tpu.dot_dimension_numbers<[1], [0], [0], [1], [0, 0, 1, 1], [], []>} : vector<16x32xbf16>, vector<32x32xbf16>, vector<16x32xf32> -> vector<16x32xf32>
    %18 = arith.addf %15, %17 : vector<16x32xf32>
    %c0_20 = arith.constant 0 : index
    %c0_21 = arith.constant 0 : index
    %19 = vector.load %arg15[%c0_20, %c0_21] : memref<16x32xf32, #tpu.memory_space<vmem>>, vector<16x32xf32>
    tpu.vector_store %arg15[%c0_20, %c0_21], %18 {strides = array<i32>} : memref<16x32xf32, #tpu.memory_space<vmem>>, vector<16x32xf32>,
    %c0_i32_22 = arith.constant 0 : i32
    %20 = arith.cmpi eq, %arg2, %c0_i32_22 : i32
    %21 = arith.extui %20 : i1 to i32
    %c0_i32_23 = arith.constant 0 : i32
    %22 = arith.cmpi ne, %21, %c0_i32_23 : i32
    scf.if %22 {
      %c0_24 = arith.constant 0 : index
      %c0_25 = arith.constant 0 : index
      %23 = vector.load %arg13[%c0_24, %c0_25] : memref<16x32xf32, #tpu.memory_space<vmem>>, vector<16x32xf32>
      %c0_26 = arith.constant 0 : index
      %c0_27 = arith.constant 0 : index
      %24 = vector.load %arg7[%c0_26, %c0_27] : memref<1x32xf32, #tpu.memory_space<vmem>>, vector<1x32xf32>
      %25 = vector.broadcast %24 : vector<1x32xf32> to vector<16x32xf32>
      %26 = arith.addf %23, %25 : vector<16x32xf32>
      %c0_28 = arith.constant 0 : index
      %c0_29 = arith.constant 0 : index
      %27 = vector.load %arg10[%c0_28, %c0_29] : memref<16x32xf32, #tpu.memory_space<vmem>>, vector<16x32xf32>
      tpu.vector_store %arg10[%c0_28, %c0_29], %26 {strides = array<i32>} : memref<16x32xf32, #tpu.memory_space<vmem>>, vector<16x32xf32>,
      %c0_30 = arith.constant 0 : index
      %c0_31 = arith.constant 0 : index
      %28 = vector.load %arg14[%c0_30, %c0_31] : memref<16x32xf32, #tpu.memory_space<vmem>>, vector<16x32xf32>
      %c0_32 = arith.constant 0 : index
      %c0_33 = arith.constant 0 : index
      %29 = vector.load %arg8[%c0_32, %c0_33] : memref<1x32xf32, #tpu.memory_space<vmem>>, vector<1x32xf32>
      %30 = vector.broadcast %29 : vector<1x32xf32> to vector<16x32xf32>
      %31 = arith.addf %28, %30 : vector<16x32xf32>
      %c0_34 = arith.constant 0 : index
      %c0_35 = arith.constant 0 : index
      %32 = vector.load %arg11[%c0_34, %c0_35] : memref<16x32xf32, #tpu.memory_space<vmem>>, vector<16x32xf32>
      tpu.vector_store %arg11[%c0_34, %c0_35], %31 {strides = array<i32>} : memref<16x32xf32, #tpu.memory_space<vmem>>, vector<16x32xf32>,
      %c0_36 = arith.constant 0 : index
      %c0_37 = arith.constant 0 : index
      %33 = vector.load %arg15[%c0_36, %c0_37] : memref<16x32xf32, #tpu.memory_space<vmem>>, vector<16x32xf32>
      %c0_38 = arith.constant 0 : index
      %c0_39 = arith.constant 0 : index
      %34 = vector.load %arg9[%c0_38, %c0_39] : memref<1x32xf32, #tpu.memory_space<vmem>>, vector<1x32xf32>
      %35 = vector.broadcast %34 : vector<1x32xf32> to vector<16x32xf32>
      %36 = arith.addf %33, %35 : vector<16x32xf32>
      %c0_40 = arith.constant 0 : index
      %c0_41 = arith.constant 0 : index
      %37 = vector.load %arg12[%c0_40, %c0_41] : memref<16x32xf32, #tpu.memory_space<vmem>>, vector<16x32xf32>
      tpu.vector_store %arg12[%c0_40, %c0_41], %36 {strides = array<i32>} : memref<16x32xf32, #tpu.memory_space<vmem>>, vector<16x32xf32>,
    } else {
    }
    return
  }
  func.func @transform_0(%arg0: i32, %arg1: i32, %arg2: i32) -> (i32, i32) {
    %c0_i32 = arith.constant 0 : i32
    return %arg1, %arg2 : i32, i32
  }
  func.func @transform_1(%arg0: i32, %arg1: i32, %arg2: i32) -> (i32, i32) {
    %c0_i32 = arith.constant 0 : i32
    return %arg2, %arg0 : i32, i32
  }
  func.func @transform_2(%arg0: i32, %arg1: i32, %arg2: i32) -> (i32, i32) {
    %c0_i32 = arith.constant 0 : i32
    return %arg2, %arg0 : i32, i32
  }
  func.func @transform_3(%arg0: i32, %arg1: i32, %arg2: i32) -> (i32, i32) {
    %c0_i32 = arith.constant 0 : i32
    return %arg2, %arg0 : i32, i32
  }
  func.func @transform_4(%arg0: i32, %arg1: i32, %arg2: i32) -> (i32, i32) {
    %c0_i32 = arith.constant 0 : i32
    %c0_i32_0 = arith.constant 0 : i32
    return %c0_i32, %arg0 : i32, i32
  }
  func.func @transform_5(%arg0: i32, %arg1: i32, %arg2: i32) -> (i32, i32) {
    %c0_i32 = arith.constant 0 : i32
    %c0_i32_0 = arith.constant 0 : i32
    return %c0_i32, %arg0 : i32, i32
  }
  func.func @transform_6(%arg0: i32, %arg1: i32, %arg2: i32) -> (i32, i32) {
    %c0_i32 = arith.constant 0 : i32
    %c0_i32_0 = arith.constant 0 : i32
    return %c0_i32, %arg0 : i32, i32
  }
  func.func @transform_7(%arg0: i32, %arg1: i32, %arg2: i32) -> (i32, i32) {
    %c0_i32 = arith.constant 0 : i32
    return %arg1, %arg0 : i32, i32
  }
  func.func @transform_8(%arg0: i32, %arg1: i32, %arg2: i32) -> (i32, i32) {
    %c0_i32 = arith.constant 0 : i32
    return %arg1, %arg0 : i32, i32
  }
  func.func @transform_9(%arg0: i32, %arg1: i32, %arg2: i32) -> (i32, i32) {
    %c0_i32 = arith.constant 0 : i32
    return %arg1, %arg0 : i32, i32
  }
}

</mosaic_0001>

<bundles_post_ra>
// kernel: _qkv_matmul.1
= control target key start
LH: loop header
LB: loop body
LE: loop exit
PB: predicated region body
PF: predicated region fallthrough
CT: control target
= control target key end

     0   :  { %15 = vsyncpa [#allocation6], 0  ;;  %s829_s0 = inlined_call_operand.hbm [shape: f32[16,32], index: 0, kind: input, shape index: {}]   ;;  %s830_s1 = inlined_call_operand.hbm [shape: bf16[32,32], index: 1, kind: input, shape index: {}]   ;;  %s831_s2 = inlined_call_operand.hbm [shape: bf16[32,32], index: 2, kind: input, shape index: {}]   ;;  %s832_s3 = inlined_call_operand.hbm [shape: bf16[32,32], index: 3, kind: input, shape index: {}]   ;;  %s833_s4 = inlined_call_operand.vmem [shape: f32[1,32], index: 4, kind: input, shape index: {}]   ;;  %s834_s5 = inlined_call_operand.vmem [shape: f32[1,32], index: 5, kind: input, shape index: {}]   ;;  %s835_s6 = inlined_call_operand.vmem [shape: f32[1,32], index: 6, kind: input, shape index: {}]   ;;  %s836_s7 = inlined_call_operand.hbm [shape: f32[16,32], index: 7, kind: output, shape index: {0}]   ;;  %s837_s8 = inlined_call_operand.hbm [shape: f32[16,32], index: 8, kind: output, shape index: {1}]   ;;  %s838_s9 = inlined_call_operand.hbm [shape: f32[16,32], index: 9, kind: output, shape index: {2}]  }
   0x1   :  { %16 = vsyncpa [#allocation9], 0 }
   0x2   :  { %17 = vsyncpa [#allocation12], 0 }
   0x3   :  { %18 = vsyncpa [#allocation7], 0 }
   0x4   :  { %19 = vsyncpa [#allocation15], 0  ;;  %s614_s30 = smov [#allocation8]   ;;  %s450_s13 = scalar_lea.hbm %s830_s1, 256 }
   0x5   :  { %s37_s10 = sshll.u32 %s614_s30, 4  ;;  %p451_p0 = scmp.ne.s32.totalorder %s830_s1, %s450_s13  ;;  %s38_s10 = int_to_ptr.vmem [resolvable:$true] %s37_s10 }
   0x6   :  { %p454_p1 = scmp.lt.u32.totalorder %s450_s13, %s830_s1 }
   0x8   :  { %p456_p2 = pnand %p454_p1, %p451_p0 }
   0xa   :  { %459 = shalt.err (!%p456_p2)
}
   0xb   :  { %s460_s18 = scalar_lea.vmem %s38_s10, 256  ;;  %p465_p4 = scmp.lt.s32.totalorder %s38_s10, %s38_s10 }
   0xc   :  { %p461_p3 = scmp.ne.s32.totalorder %s38_s10, %s460_s18  ;;  %p466_p5 = scmp.lt.s32.totalorder %s460_s18, %s460_s18 }
   0xe   :  { %p467_p6 = por %p466_p5, %p465_p4 }
  0x10   :  { %p468_p7 = pnand %p467_p6, %p461_p3 }
  0x12   :  { %471 = shalt.err (!%p468_p7)
}
  0x13   :  { %s615_s19 = smov 64   ;;  %s616_s20 = smov 4  }
  0x14   :  { %43 = dma.hbm_to_vmem [thread:$0]  %s830_s1, 256, %s38_s10, [#allocation9], %s615_s19, %s615_s19, %s616_s20  }
  0x15   :  { %s617_s23 = smov [#allocation5]   ;;  %s472_s27 = scalar_lea.hbm %s829_s0, 256 }
  0x16   :  { %s25_s24 = sshll.u32 %s617_s23, 4  ;;  %p473_p8 = scmp.ne.s32.totalorder %s829_s0, %s472_s27  ;;  %s26_s24 = int_to_ptr.vmem [resolvable:$true] %s25_s24 }
  0x17   :  { %p476_p9 = scmp.lt.u32.totalorder %s472_s27, %s829_s0 }
  0x19   :  { %p478_p10 = pnand %p476_p9, %p473_p8 }
  0x1b   :  { %481 = shalt.err (!%p478_p10)
}
  0x1c   :  { %s482_s12 = scalar_lea.vmem %s26_s24, 256  ;;  %p487_p12 = scmp.lt.s32.totalorder %s26_s24, %s26_s24 }
  0x1d   :  { %p483_p11 = scmp.ne.s32.totalorder %s26_s24, %s482_s12  ;;  %p488_p13 = scmp.lt.s32.totalorder %s482_s12, %s482_s12 }
  0x1f   :  { %p489_p0 = por %p488_p13, %p487_p12 }
  0x21   :  { %p490_p1 = pnand %p489_p0, %p483_p11 }
  0x23   :  { %493 = shalt.err (!%p490_p1)
}
  0x24   :  { %s618_s1 = smov 128   ;;  %s619_s10 = smov 8  }
  0x25   :  { %31 = dma.hbm_to_vmem [thread:$0]  %s829_s0, 256, %s26_s24, [#allocation6], %s618_s1, %s618_s1, %s619_s10  }
  0x26   :  { %s620_s15 = smov [#allocation10]   ;;  %s621_s17 = smov [#allocation11]  }
  0x27   :  { %s49_s16 = sshll.u32 %s620_s15, 4  ;;  %s61_s18 = sshll.u32 %s621_s17, 4  ;;  %s50_s16 = int_to_ptr.vmem [resolvable:$true] %s49_s16  ;;  %s707_s18 = int_to_ptr.vmem [resolvable:$true] %s61_s18 }
  0x28   :  { %s494_s23 = scalar_lea.hbm %s831_s2, 256 }
  0x29   :  { %p495_p2 = scmp.ne.s32.totalorder %s831_s2, %s494_s23  ;;  %p498_p3 = scmp.lt.u32.totalorder %s494_s23, %s831_s2 }
  0x2b   :  { %p500_p4 = pnand %p498_p3, %p495_p2 }
  0x2d   :  { %503 = shalt.err (!%p500_p4)
}
  0x2e   :  { %s504_s0 = scalar_lea.vmem %s50_s16, 256  ;;  %p509_p6 = scmp.lt.s32.totalorder %s50_s16, %s50_s16 }
  0x2f   :  { %p505_p5 = scmp.ne.s32.totalorder %s50_s16, %s504_s0  ;;  %p510_p7 = scmp.lt.s32.totalorder %s504_s0, %s504_s0 }
  0x31   :  { %p511_p8 = por %p510_p7, %p509_p6 }
  0x33   :  { %p512_p9 = pnand %p511_p8, %p505_p5 }
  0x35   :  { %515 = shalt.err (!%p512_p9)
}
  0x36   :  { %55 = dma.hbm_to_vmem [thread:$0]  %s831_s2, 256, %s50_s16, [#allocation9], %s615_s19, %s615_s19, %s616_s20  }
  0x37   :  { %s516_s12 = scalar_lea.hbm %s832_s3, 256 }
  0x38   :  { %p517_p10 = scmp.ne.s32.totalorder %s832_s3, %s516_s12  ;;  %p520_p11 = scmp.lt.u32.totalorder %s516_s12, %s832_s3 }
  0x3a   :  { %p522_p12 = pnand %p520_p11, %p517_p10 }
  0x3c   :  { %525 = shalt.err (!%p522_p12)
}
  0x3d   :  { %s526_s21 = scalar_lea.vmem %s707_s18, 256  ;;  %p531_p0 = scmp.lt.s32.totalorder %s707_s18, %s707_s18 }
  0x3e   :  { %p527_p13 = scmp.ne.s32.totalorder %s707_s18, %s526_s21  ;;  %p532_p1 = scmp.lt.s32.totalorder %s526_s21, %s526_s21 }
  0x40   :  { %p533_p2 = por %p532_p1, %p531_p0 }
  0x42   :  { %p534_p3 = pnand %p533_p2, %p527_p13 }
  0x44   :  { %537 = shalt.err (!%p534_p3)
}
  0x45   :  { %67 = dma.hbm_to_vmem [thread:$0]  %s832_s3, 256, %s707_s18, [#allocation12], %s615_s19, %s615_s19, %s616_s20  }
  0x46   :  { %604 = dma.done.wait [#allocation6], 256  }
  0x47   :  { %605 = vsyncadd [#allocation6], 4294967040 }
  0x48   :  { %606 = dma.done.wait [#allocation9], 512  }
  0x49   :  { %607 = vsyncadd [#allocation9], 4294966784 }
  0x4a   :  { %608 = dma.done.wait [#allocation12], 256  }
  0x4b   :  { %609 = vsyncadd [#allocation12], 4294967040  ;;  %vm91_vm0 = vcmask 261120   ;;  %v622_v0 = vmov 0.0   ;;  %vm623_vm1 = vmmov 0   ;;  %v444_v1 = vld [vmem:[#allocation8] sm:$0xff]  }
  0x4c   :  { %407 = vmatprep.subr.bf16.mxu0 %v622_v0  ;;  %415 = vmatprep.subr.bf16.mxu1 %v622_v0  ;;  %92 = vst.msk [vmem:[#allocation2] sm:$0xff] %vm91_vm0, %v622_v0  ;;  %93 = vst.msk [vmem:[#allocation2 + $0x8] sm:$0xff] %vm91_vm0, %v622_v0  ;;  %v445_v2 = vld [vmem:[#allocation8 + $0x8] sm:$0xff]   ;;  %v446_v3 = vld [vmem:[#allocation10] sm:$0xff]   ;;  %s624_s22 = smov [#allocation13]   ;;  %s625_s25 = smov [#allocation14]  }
  0x4d   :  { %94 = vst.msk [vmem:[#allocation3] sm:$0xff] %vm91_vm0, %v622_v0  ;;  %95 = vst.msk [vmem:[#allocation3 + $0x8] sm:$0xff] %vm91_vm0, %v622_v0  ;;  %411 = vmatprep.mubr.msk.bf16.mxu0 %vm623_vm1, %v622_v0  ;;  %419 = vmatprep.mubr.msk.bf16.mxu1 %vm623_vm1, %v622_v0  ;;  %v98_v4 = vld [vmem:[#allocation5] sm:$0xff]  ;;  %v99_v5 = vld [vmem:[#allocation5 + $0x8] sm:$0xff]  ;;  %s341_s23 = sshll.u32 %s624_s22, 4  ;;  %s353_s26 = sshll.u32 %s625_s25, 4  ;;  %s342_s23 = int_to_ptr.vmem [resolvable:$true] %s341_s23  ;;  %s770_s26 = int_to_ptr.vmem [resolvable:$true] %s353_s26 }
  0x4e   :  { %96 = vst.msk [vmem:[#allocation4] sm:$0xff] %vm91_vm0, %v622_v0  ;;  %97 = vst.msk [vmem:[#allocation4 + $0x8] sm:$0xff] %vm91_vm0, %v622_v0  ;;  %408 = vmatpush3.bf16.msra.mxu0 %v444_v1  ;;  %416 = vmatpush3.bf16.msra.mxu1 %v446_v3  ;;  %v100_v6 = vpack.c.bf16 %v99_v5, %v98_v4  ;;  %v448_v7 = vld [vmem:[#allocation10 + $0x8] sm:$0xff]   ;;  %v447_v8 = vld [vmem:[#allocation11] sm:$0xff]   ;;  %s538_s27 = scalar_lea.vmem %s342_s23, 256  ;;  %p543_p5 = scmp.lt.s32.totalorder %s342_s23, %s342_s23 }
  0x4f   :  { %409 = vmatprep.subr.bf16.mxu0 %v622_v0  ;;  %417 = vmatprep.subr.bf16.mxu1 %v622_v0  ;;  %v449_v9 = vld [vmem:[#allocation11 + $0x8] sm:$0xff]   ;;  %v395_v29 = vld [vmem:[%s833_s4] ss:$0 sm:$0xff]  ;;  %p539_p4 = scmp.ne.s32.totalorder %s342_s23, %s538_s27  ;;  %p544_p6 = scmp.lt.s32.totalorder %s538_s27, %s538_s27 }
  0x50   :  { %v396_v33 = vld [vmem:[%s834_s5] ss:$0 sm:$0xff] }
  0x51   :  { %v397_v44 = vld [vmem:[%s835_s6] ss:$0 sm:$0xff]  ;;  %p545_p7 = por %p544_p6, %p543_p5 }
  0x52   :  { %410 = vmatpush3.bf16.msra.mxu0 %v445_v2  ;;  %418 = vmatpush3.bf16.msra.mxu1 %v448_v7 }
  0x53   :  { %423 = vmatprep.subr.bf16.mxu0 %v622_v0  ;;  %v101_v10 = vld [vmem:[#allocation2] sm:$0xff]  ;;  %v102_v12 = vld [vmem:[#allocation2 + $0x8] sm:$0xff]  ;;  %p546_p8 = pnand %p545_p7, %p539_p4 }
  0x54   :  { %v168_v13 = vld [vmem:[#allocation3] sm:$0xff]  ;;  %v169_v18 = vld [vmem:[#allocation3 + $0x8] sm:$0xff] }
  0x55   :  { %412 = vmatmul.mubr.msk.bf16.vlgmr.msra.gmra.mrb[0].mxu0 %vm91_vm0, %v100_v6  ;;  %420 = vmatmul.mubr.msk.bf16.vlgmr.msra.gmra.mrb[0].mxu1 %vm91_vm0, %v100_v6  ;;  %v231_v26 = vld [vmem:[#allocation4] sm:$0xff]  ;;  %v232_v28 = vld [vmem:[#allocation4 + $0x8] sm:$0xff] }
  0x56   :  { %424 = vmatpush3.bf16.msra.mxu0 %v447_v8  ;;  %427 = vmatprep.mubr.msk.bf16.mxu0 %vm623_vm1, %v622_v0 }
  0x57   :  { %425 = vmatprep.subr.bf16.mxu0 %v622_v0 }
  0x5a   :  { %426 = vmatpush3.bf16.msra.mxu0 %v449_v9 }
  0x5d   :  { %428 = vmatmul.mubr.msk.bf16.vlgmr.msra.gmra.mrb[4].mxu0 %vm91_vm0, %v100_v6 }
 0x128   :  { %v157_v11 = vpop.f32.mrb[0].mxu0  ;;  %v220_v17 = vpop.f32.mrb[0].mxu1 }
 0x129   :  { %v164_v14 = vadd.f32 %v157_v11, %v101_v10  ;;  %v413_v15 = vpop.f32.mrb[1].mxu0  ;;  %v227_v21 = vadd.f32 %v220_v17, %v168_v13  ;;  %v421_v22 = vpop.f32.mrb[1].mxu1 }
 0x12a   :  { %v160_v16 = vpop.f32.mrb[2].mxu0  ;;  %v223_v23 = vpop.f32.mrb[2].mxu1 }
 0x12b   :  { %166 = vst.msk [vmem:[#allocation2] sm:$0xff] %vm91_vm0, %v164_v14  ;;  %v165_v19 = vadd.f32 %v160_v16, %v102_v12  ;;  %v414_v20 = vpop.f32.mrb[3].mxu0  ;;  %229 = vst.msk [vmem:[#allocation3] sm:$0xff] %vm91_vm0, %v227_v21  ;;  %v228_v24 = vadd.f32 %v223_v23, %v169_v18  ;;  %v422_v25 = vpop.f32.mrb[3].mxu1 }
 0x12d   :  { %167 = vst.msk [vmem:[#allocation2 + $0x8] sm:$0xff] %vm91_vm0, %v165_v19  ;;  %230 = vst.msk [vmem:[#allocation3 + $0x8] sm:$0xff] %vm91_vm0, %v228_v24 }
 0x130   :  { %v283_v27 = vpop.f32.mrb[4].mxu0 }
 0x131   :  { %v290_v30 = vadd.f32 %v283_v27, %v231_v26  ;;  %v429_v31 = vpop.f32.mrb[5].mxu0 }
 0x132   :  { %v286_v32 = vpop.f32.mrb[6].mxu0  ;;  %v297_v34 = vld [vmem:[#allocation2] sm:$0xff]  ;;  %v310_v38 = vld [vmem:[#allocation3] sm:$0xff] }
 0x133   :  { %292 = vst.msk [vmem:[#allocation4] sm:$0xff] %vm91_vm0, %v290_v30  ;;  %v291_v35 = vadd.f32 %v286_v32, %v232_v28  ;;  %v430_v36 = vpop.f32.mrb[7].mxu0  ;;  %v306_v37 = vadd.f32 %v395_v29, %v297_v34  ;;  %v319_v40 = vadd.f32 %v396_v33, %v310_v38 }
 0x134   :  { %v298_v39 = vld [vmem:[#allocation2 + $0x8] sm:$0xff]  ;;  %v311_v42 = vld [vmem:[#allocation3 + $0x8] sm:$0xff] }
 0x135   :  { %293 = vst.msk [vmem:[#allocation4 + $0x8] sm:$0xff] %vm91_vm0, %v291_v35  ;;  %v307_v41 = vadd.f32 %v395_v29, %v298_v39  ;;  %308 = vst.msk [vmem:[#allocation13] sm:$0xff] %vm91_vm0, %v306_v37  ;;  %v320_v43 = vadd.f32 %v396_v33, %v311_v42 }
 0x136   :  { %321 = vst.msk [vmem:[#allocation14] sm:$0xff] %vm91_vm0, %v319_v40 }
 0x137   :  { %309 = vst.msk [vmem:[#allocation13 + $0x8] sm:$0xff] %vm91_vm0, %v307_v41 }
 0x138   :  { %549 = shalt.err (!%p546_p8)
}
 0x139   :  { %s550_s24 = scalar_lea.hbm %s836_s7, 256 }
 0x13a   :  { %p551_p9 = scmp.ne.s32.totalorder %s836_s7, %s550_s24  ;;  %p554_p10 = scmp.lt.u32.totalorder %s550_s24, %s836_s7 }
 0x13c   :  { %p556_p11 = pnand %p554_p10, %p551_p9 }
 0x13e   :  { %559 = shalt.err (!%p556_p11)
}
 0x13f   :  { %347 = dma.vmem_to_hbm [thread:$0]  %s342_s23, 256, %s836_s7, [#allocation7], %s618_s1, %s618_s1, %s619_s10   ;;  %322 = vst.msk [vmem:[#allocation14 + $0x8] sm:$0xff] %vm91_vm0, %v320_v43 }
 0x140   :  { %s626_s14 = smov [#allocation16]   ;;  %s560_s17 = scalar_lea.vmem %s770_s26, 256 }
 0x141   :  { %s365_s15 = sshll.u32 %s626_s14, 4  ;;  %p561_p12 = scmp.ne.s32.totalorder %s770_s26, %s560_s17  ;;  %s366_s15 = int_to_ptr.vmem [resolvable:$true] %s365_s15 }
 0x142   :  { %p565_p13 = scmp.lt.s32.totalorder %s770_s26, %s770_s26  ;;  %p566_p0 = scmp.lt.s32.totalorder %s560_s17, %s560_s17 }
 0x144   :  { %p567_p1 = por %p566_p0, %p565_p13 }
 0x146   :  { %p568_p2 = pnand %p567_p1, %p561_p12 }
 0x148   :  { %571 = shalt.err (!%p568_p2)
}
 0x149   :  { %s572_s16 = scalar_lea.hbm %s837_s8, 256 }
 0x14a   :  { %p573_p3 = scmp.ne.s32.totalorder %s837_s8, %s572_s16  ;;  %p576_p4 = scmp.lt.u32.totalorder %s572_s16, %s837_s8 }
 0x14c   :  { %p578_p5 = pnand %p576_p4, %p573_p3 }
 0x14e   :  { %581 = shalt.err (!%p578_p5)
}
 0x14f   :  { %359 = dma.vmem_to_hbm [thread:$0]  %s770_s26, 256, %s837_s8, [#allocation15], %s618_s1, %s618_s1, %s619_s10   ;;  %v323_v45 = vld [vmem:[#allocation4] sm:$0xff]  ;;  %v324_v47 = vld [vmem:[#allocation4 + $0x8] sm:$0xff] }
 0x150   :  { %v332_v46 = vadd.f32 %v397_v44, %v323_v45  ;;  %v333_v48 = vadd.f32 %v397_v44, %v324_v47  ;;  %s582_s23 = scalar_lea.vmem %s366_s15, 256  ;;  %p587_p7 = scmp.lt.s32.totalorder %s366_s15, %s366_s15 }
 0x151   :  { %p583_p6 = scmp.ne.s32.totalorder %s366_s15, %s582_s23  ;;  %p588_p8 = scmp.lt.s32.totalorder %s582_s23, %s582_s23 }
 0x152   :  { %334 = vst.msk [vmem:[#allocation16] sm:$0xff] %vm91_vm0, %v332_v46  ;;  %335 = vst.msk [vmem:[#allocation16 + $0x8] sm:$0xff] %vm91_vm0, %v333_v48 }
 0x153   :  { %p589_p9 = por %p588_p8, %p587_p7 }
 0x155   :  { %p590_p10 = pnand %p589_p9, %p583_p6 }
 0x157   :  { %593 = shalt.err (!%p590_p10)
}
 0x158   :  { %s594_s8 = scalar_lea.hbm %s838_s9, 256 }
 0x159   :  { %p595_p11 = scmp.ne.s32.totalorder %s838_s9, %s594_s8  ;;  %p598_p12 = scmp.lt.u32.totalorder %s594_s8, %s838_s9 }
 0x15b   :  { %p600_p13 = pnand %p598_p12, %p595_p11 }
 0x15d   :  { %603 = shalt.err (!%p600_p13)
}
 0x15e   :  { %371 = dma.vmem_to_hbm [thread:$0]  %s366_s15, 256, %s838_s9, [#allocation15], %s618_s1, %s618_s1, %s619_s10  }
 0x15f   :  { %610 = dma.done.wait [#allocation7], 256  }
 0x160   :  { %611 = vsyncadd [#allocation7], 4294967040 }
 0x161   :  { %612 = dma.done.wait [#allocation15], 512  }
 0x162   :  { %613 = vsyncadd [#allocation15], 4294966784 }
 0x163   :  { %381 = vsyncpa [#allocation6], 1 }
 0x164   :  { %382 = vsyncpa [#allocation9], 1 }
 0x165   :  { %383 = vsyncpa [#allocation12], 1 }
 0x166   :  { %384 = vsyncpa [#allocation7], 1 }
 0x167   :  { %385 = vsyncpa [#allocation15], 1 }

</bundles_post_ra>
